<compile_context>
chip_gen: v7x
topology: tpu7x:2x2x1
jax: 0.10.0
libtpu: 0.0.40
codegen_flags: <defaults>
</compile_context>

<pallas_src>
import functools

import jax
import jax.numpy as jnp
from jax.experimental import pallas as pl
from jax.experimental.pallas import tpu as pltpu


_LANE = 128


def _round_up(x, m):
    return ((x + m - 1) // m) * m


def _sublane(dtype):
    # Minimum sublane multiple per dtype (sub-32-bit dtypes pack along sublanes).
    return {4: 8, 2: 16, 1: 32}[jnp.dtype(dtype).itemsize]


def _pick_tile(dim, unit, max_tile):
    """Tile size (multiple of `unit`, <= max_tile) minimizing the padding
    round_up(dim, tile) - dim; ties broken toward the largest tile."""
    limit = min(max(max_tile, unit), _round_up(dim, unit))
    best, best_pad = unit, _round_up(dim, unit) - dim
    cand = unit
    while cand <= limit:
        pad = _round_up(dim, cand) - dim
        if pad < best_pad or (pad == best_pad and cand > best):
            best, best_pad = cand, pad
        cand += unit
    return best


def _vmem_budget_bytes():
    # Leave ~25% headroom for compiler-internal scratch (critical on v7x's
    # 64 MiB per-TensorCore VMEM).
    try:
        return int(pltpu.get_tpu_info().vmem_capacity_bytes * 3 // 4)
    except Exception:
        return 48 * 1024 * 1024


_VMEM_BUDGET = _vmem_budget_bytes()
_FULL_K_BUDGET = min(40 * 1024 * 1024, (_VMEM_BUDGET * 2) // 3)


def _tile_bytes(tm, tn, tk, x_dtype, w_dtype, o_dtype, with_acc):
    xb = jnp.dtype(x_dtype).itemsize
    wb = jnp.dtype(w_dtype).itemsize
    ob = jnp.dtype(o_dtype).itemsize
    nbytes = 2 * (tm * tk * xb + tk * tn * wb + tn * 4 + tm * tn * ob)
    if with_acc:
        nbytes += tm * tn * 4
    return nbytes


# ----------------------------- kernels --------------------------------------


def _smooth_fc_kernel_fullk(x_ref, wt_ref, b_ref, o_ref):
    # Whole K resident: single MXU pass, bias added once, no scratch.
    acc = jnp.dot(x_ref[...], wt_ref[...], preferred_element_type=jnp.float32)
    o_ref[...] = (acc + b_ref[...]).astype(o_ref.dtype)


def _smooth_fc_kernel_ksplit(x_ref, wt_ref, b_ref, o_ref, acc_ref):
    # x_ref: (tm, tk)  wt_ref: (tk, tn)  b_ref: (1, tn)  o_ref: (tm, tn)
    # acc_ref: (tm, tn) f32 scratch, resident across the K grid axis.
    k = pl.program_id(2)

    @pl.when(k == 0)
    def _():
        # Seed the accumulator with the broadcast bias: removes the (tm, tn)
        # VPU add from the critical final-step path.
        acc_ref[...] = jnp.broadcast_to(b_ref[...], acc_ref.shape).astype(jnp.float32)

    acc_ref[...] += jnp.dot(
        x_ref[...], wt_ref[...], preferred_element_type=jnp.float32
    )

    @pl.when(k == pl.num_programs(2) - 1)
    def _():
        o_ref[...] = acc_ref[...].astype(o_ref.dtype)


# ----------------------------- jitted forward -------------------------------


@functools.partial(
    jax.jit,
    static_argnames=("tm", "tn", "tk", "split_k", "vmem_limit", "out_features"),
)
def _smooth_fc_forward(x, w_p, b_p, *, tm, tn, tk, split_k, vmem_limit,
                       out_features):
    """y = x @ w_p + b_p (sliced back to [B, out_features]).

    x:   [B, F_in]           (any float dtype; cast to w_p.dtype for the MXU)
    w_p: [Kp, Np]            pre-transposed, pre-padded, lane-dense MXU RHS
    b_p: [1, Np]             pre-padded f32 bias row
    """
    B, F_in = x.shape
    Kp, Np = w_p.shape
    out_dtype = x.dtype

    x_c = x.astype(w_p.dtype)
    Bp = _round_up(B, tm)
    if (Bp, Kp) != (B, F_in):
        # Zero padding is exact (pad rows/cols contribute nothing) and is
        # elided by XLA when already aligned.
        x_c = jnp.pad(x_c, ((0, Bp - B), (0, Kp - F_in)))

    if split_k:
        grid = (Bp // tm, Np // tn, Kp // tk)
        out_p = pl.pallas_call(
            _smooth_fc_kernel_ksplit,
            out_shape=jax.ShapeDtypeStruct((Bp, Np), out_dtype),
            grid_spec=pltpu.PrefetchScalarGridSpec(
                num_scalar_prefetch=0,
                grid=grid,
                in_specs=[
                    pl.BlockSpec((tm, tk), lambda i, j, k: (i, k)),
                    pl.BlockSpec((tk, tn), lambda i, j, k: (k, j)),
                    pl.BlockSpec((1, tn), lambda i, j, k: (0, j)),
                ],
                out_specs=pl.BlockSpec((tm, tn), lambda i, j, k: (i, j)),
                scratch_shapes=[pltpu.VMEM((tm, tn), jnp.float32)],
            ),
            compiler_params=pltpu.CompilerParams(
                dimension_semantics=("parallel", "parallel", "arbitrary"),
                vmem_limit_bytes=int(vmem_limit),
            ),
        )(x_c, w_p, b_p)
    else:
        grid = (Bp // tm, Np // tn)
        out_p = pl.pallas_call(
            _smooth_fc_kernel_fullk,
            out_shape=jax.ShapeDtypeStruct((Bp, Np), out_dtype),
            grid_spec=pltpu.PrefetchScalarGridSpec(
                num_scalar_prefetch=0,
                grid=grid,
                in_specs=[
                    pl.BlockSpec((tm, tk), lambda i, j: (i, 0)),
                    pl.BlockSpec((tk, tn), lambda i, j: (0, j)),
                    pl.BlockSpec((1, tn), lambda i, j: (0, j)),
                ],
                out_specs=pl.BlockSpec((tm, tn), lambda i, j: (i, j)),
            ),
            compiler_params=pltpu.CompilerParams(
                dimension_semantics=("parallel", "parallel"),
                vmem_limit_bytes=int(vmem_limit),
            ),
        )(x_c, w_p, b_p)

    if (Bp, Np) != (B, out_features):
        out_p = out_p[:B, :out_features]
    return out_p


# ----------------------------- module wrapper --------------------------------


class SmoothFCPallas:
    """Mirror of SmoothFC.__init__ with deterministic synthetic parameters."""

    def __init__(self, input_features, output_features, bias=True, key=None,
                 compute_dtype=jnp.bfloat16,
                 max_tile_m=512, max_tile_n=512, max_tile_k=2048):
        self.input_features = input_features
        self.output_features = output_features
        self.bias = bias
        self.sl = jnp.float32(0.0)  # smooth-loss accumulator (unused in forward)
        self.compute_dtype = jnp.dtype(compute_dtype)
        self._max_tile_m = max_tile_m

        key = jax.random.PRNGKey(0) if key is None else key
        k_w, k_b = jax.random.split(key)
        bound = 1.0 / jnp.sqrt(jnp.float32(input_features))
        self.weight = jax.random.uniform(
            k_w, (output_features, input_features),
            minval=-bound, maxval=bound, dtype=jnp.float32)
        if bias:
            self.b = jax.random.uniform(
                k_b, (output_features,),
                minval=-bound, maxval=bound, dtype=jnp.float32)
        else:
            self.b = jnp.zeros((output_features,), dtype=jnp.float32)

        # ---- one-time layout work (hoisted out of forward) ----------------
        # Padding-minimizing tiles for the weight dims (zero padding whenever
        # F_in / F_out are multiples of 128, incl. shapes like 640 x 384).
        self._tn = _pick_tile(output_features, _LANE, max_tile_n)
        self._tk = _pick_tile(input_features, _LANE, max_tile_k)
        self._Np = _round_up(output_features, self._tn)
        self._Kp = _round_up(input_features, self._tk)

        # Weight transposed ONCE -> lane-dense [F_in, F_out] MXU RHS, cast to
        # the bf16-native MXU dtype, and zero-padded ONCE to tile multiples.
        w_t = self.weight.T.astype(self.compute_dtype)
        self._w_p = jnp.pad(
            w_t,
            ((0, self._Kp - input_features), (0, self._Np - output_features)))
        self._b_p = jnp.pad(
            self.b.reshape(1, output_features).astype(jnp.float32),
            ((0, 0), (0, self._Np - output_features)))

    def __call__(self, x):
        return self.forward_impl(x)

    def forward_impl(self, x):
        assert x.ndim == 2 and x.shape[1] == self.input_features
        B = x.shape[0]
        Kp, Np = self._Kp, self._Np
        tn = self._tn

        # dtype-aware sublane rounding (16 for bf16, 8 for f32, 32 for int8).
        sub = _sublane(self.compute_dtype)
        tm = _pick_tile(B, sub, self._max_tile_m)
        Bp = _round_up(B, tm)

        # v7x megacore: guarantee >=2 parallel (M, N) grid blocks so both
        # TensorCores get work; split N when M can't be split.
        if (Bp // tm) * (Np // tn) == 1 and Np >= 2 * _LANE:
            cand = (Np // 2) // _LANE * _LANE
            while cand >= _LANE and Np % cand != 0:
                cand -= _LANE
            if cand >= _LANE:
                tn = cand

        # Single-pass kernel when the whole (padded) K fits comfortably in
        # VMEM (the common FC case); otherwise K-split with an f32 accumulator.
        full_k_bytes = _tile_bytes(tm, tn, Kp, self.compute_dtype,
                                   self.compute_dtype, x.dtype, with_acc=False)
        if full_k_bytes <= _FULL_K_BUDGET:
            tk, split_k, work_bytes = Kp, False, full_k_bytes
        else:
            tk, split_k = self._tk, True
            work_bytes = _tile_bytes(tm, tn, tk, self.compute_dtype,
                                     self.compute_dtype, x.dtype, with_acc=True)
        vmem_limit = min(_VMEM_BUDGET, max(32 * 1024 * 1024, 2 * work_bytes))

        return _smooth_fc_forward(
            x, self._w_p, self._b_p,
            tm=tm, tn=tn, tk=tk, split_k=split_k,
            vmem_limit=int(vmem_limit),
            out_features=self.output_features)


if __name__ == "__main__":
    key = jax.random.PRNGKey(0)
    k_x, k_params, k_x2, k_params2 = jax.random.split(key, 4)

    def ref_fwd(mod, xv):
        # Reference matching the kernel's bf16 MXU inputs / f32 accumulation.
        xb = xv.astype(jnp.bfloat16).astype(jnp.float32)
        wb = mod.weight.T.astype(jnp.bfloat16).astype(jnp.float32)
        return xb @ wb + mod.b

    # --- case 1: small shapes (single grid point, padded to lane-dense 128) ---
    batch, f_in, f_out = 8, 32, 16
    x = jax.random.normal(k_x, (batch, f_in), dtype=jnp.float32)
    module = SmoothFCPallas(f_in, f_out, bias=True, key=k_params)
    y = jax.block_until_ready(module(x))
    assert y.shape == (batch, f_out) and y.dtype == jnp.float32
    assert jnp.allclose(y, ref_fwd(module, x), atol=5e-3, rtol=5e-3)

    # --- case 2: multi-block N grid, zero-padding tile choice (640 x 384) ---
    b2, f_in2, f_out2 = 32, 640, 384
    x2 = jax.random.normal(k_x2, (b2, f_in2), dtype=jnp.float32)
    module2 = SmoothFCPallas(f_in2, f_out2, bias=True, key=k_params2)
    y2 = jax.block_until_ready(module2(x2))
    assert y2.shape == (b2, f_out2)
    assert jnp.allclose(y2, ref_fwd(module2, x2), atol=5e-3, rtol=5e-3)

    print("KERNEL_OK")
</pallas_src>

<mosaic_0001>
module attributes {stable_mosaic.version = 11 : i64} {
  func.func @_smooth_fc_kernel_fullk(%arg0: i32, %arg1: i32, %arg2: memref<16x128xbf16, #tpu.memory_space<vmem>>, %arg3: memref<128x128xbf16, #tpu.memory_space<vmem>>, %arg4: memref<1x128xf32, #tpu.memory_space<vmem>>, %arg5: memref<16x128xf32, #tpu.memory_space<vmem>>) attributes {dimension_semantics = [#tpu.dimension_semantics<parallel>, #tpu.dimension_semantics<parallel>], iteration_bounds = array<i64: 1, 1>, scalar_prefetch = 0 : i64, scratch_operands = 0 : i64, tpu.core_type = #tpu.core_type<tc>, window_params = [{transform_indices = @transform_0, window_bounds = array<i64: 16, 128>}, {transform_indices = @transform_1, window_bounds = array<i64: 128, 128>}, {transform_indices = @transform_2, window_bounds = array<i64: 1, 128>}, {transform_indices = @transform_3, window_bounds = array<i64: 16, 128>}]} {
    %c0 = arith.constant 0 : index
    %c0_0 = arith.constant 0 : index
    %0 = vector.load %arg2[%c0, %c0_0] : memref<16x128xbf16, #tpu.memory_space<vmem>>, vector<16x128xbf16>
    %c0_1 = arith.constant 0 : index
    %c0_2 = arith.constant 0 : index
    %1 = vector.load %arg3[%c0_1, %c0_2] : memref<128x128xbf16, #tpu.memory_space<vmem>>, vector<128x128xbf16>
    %cst = arith.constant dense<0.000000e+00> : vector<16x128xf32>
    %2 = tpu.matmul %0, %1, %cst {dimension_numbers = #tpu.dot_dimension_numbers<[1], [0], [0], [1], [0, 0, 1, 1], [], []>} : vector<16x128xbf16>, vector<128x128xbf16>, vector<16x128xf32> -> vector<16x128xf32>
    %c0_3 = arith.constant 0 : index
    %c0_4 = arith.constant 0 : index
    %3 = vector.load %arg4[%c0_3, %c0_4] : memref<1x128xf32, #tpu.memory_space<vmem>>, vector<1x128xf32>
    %4 = vector.broadcast %3 : vector<1x128xf32> to vector<16x128xf32>
    %5 = arith.addf %2, %4 : vector<16x128xf32>
    %c0_5 = arith.constant 0 : index
    %c0_6 = arith.constant 0 : index
    %6 = vector.load %arg5[%c0_5, %c0_6] : memref<16x128xf32, #tpu.memory_space<vmem>>, vector<16x128xf32>
    tpu.vector_store %arg5[%c0_5, %c0_6], %5 {strides = array<i32>} : memref<16x128xf32, #tpu.memory_space<vmem>>, vector<16x128xf32>,
    return
  }
  func.func @transform_0(%arg0: i32, %arg1: i32) -> (i32, i32) {
    %c0_i32 = arith.constant 0 : i32
    %c0_i32_0 = arith.constant 0 : i32
    return %arg0, %c0_i32 : i32, i32
  }
  func.func @transform_1(%arg0: i32, %arg1: i32) -> (i32, i32) {
    %c0_i32 = arith.constant 0 : i32
    %c0_i32_0 = arith.constant 0 : i32
    return %c0_i32, %arg1 : i32, i32
  }
  func.func @transform_2(%arg0: i32, %arg1: i32) -> (i32, i32) {
    %c0_i32 = arith.constant 0 : i32
    %c0_i32_0 = arith.constant 0 : i32
    return %c0_i32, %arg1 : i32, i32
  }
  func.func @transform_3(%arg0: i32, %arg1: i32) -> (i32, i32) {
    %c0_i32 = arith.constant 0 : i32
    return %arg0, %arg1 : i32, i32
  }
}

</mosaic_0001>

<bundles_post_ra>
// kernel: _smooth_fc_forward.1
= control target key start
LH: loop header
LB: loop body
LE: loop exit
PB: predicated region body
PF: predicated region fallthrough
CT: control target
= control target key end

     0   :  { %8 = vsyncpa [#allocation3], 0  ;;  %s233_s12 = smov [#allocation2]   ;;  %s282_s0 = inlined_call_operand.vmem [shape: bf16[16,128], index: 0, kind: input, shape index: {}]   ;;  %s283_s1 = inlined_call_operand.hbm [shape: bf16[128,128], index: 1, kind: input, shape index: {}]   ;;  %s284_s2 = inlined_call_operand.vmem [shape: f32[1,128], index: 2, kind: input, shape index: {}]   ;;  %s285_s3 = inlined_call_operand.vmem [shape: f32[16,128], index: 3, kind: output, shape index: {}]  }
   0x1   :  { %s16_s13 = sshll.u32 %s233_s12, 4  ;;  %s209_s16 = scalar_lea.hbm %s283_s1, 1024  ;;  %s17_s13 = int_to_ptr.vmem [resolvable:$true] %s16_s13 }
   0x2   :  { %p210_p0 = scmp.ne.s32.totalorder %s283_s1, %s209_s16  ;;  %p213_p1 = scmp.lt.u32.totalorder %s209_s16, %s283_s1 }
   0x4   :  { %p215_p2 = pnand %p213_p1, %p210_p0 }
   0x6   :  { %218 = shalt.err (!%p215_p2)
}
   0x7   :  { %s219_s21 = scalar_lea.vmem %s17_s13, 1024  ;;  %p224_p4 = scmp.lt.s32.totalorder %s17_s13, %s17_s13 }
   0x8   :  { %p220_p3 = scmp.ne.s32.totalorder %s17_s13, %s219_s21  ;;  %p225_p5 = scmp.lt.s32.totalorder %s219_s21, %s219_s21 }
   0xa   :  { %p226_p6 = por %p225_p5, %p224_p4 }
   0xc   :  { %p227_p7 = pnand %p226_p6, %p220_p3 }
   0xe   :  { %230 = shalt.err (!%p227_p7)
}
   0xf   :  { %s234_s22 = smov 64   ;;  %s235_s23 = smov 4  }
  0x10   :  { %22 = dma.hbm_to_vmem [thread:$0]  %s283_s1, 1024, %s17_s13, [#allocation3], %s234_s22, %s234_s22, %s235_s23  }
  0x11   :  { %231 = dma.done.wait [#allocation3], 1024  }
  0x12   :  { %232 = vsyncadd [#allocation3], 4294966272  ;;  %v236_v0 = vmov 0.0   ;;  %vm237_vm0 = vmmov 0   ;;  %v200_v1 = vld [vmem:[#allocation2] sm:$0xff]   ;;  %v201_v2 = vld [vmem:[#allocation2 + $0x8] sm:$0xff]  }
  0x13   :  { %175 = vmatprep.subr.bf16.mxu0 %v236_v0  ;;  %191 = vmatprep.mubr.msk.bf16.mxu0 %vm237_vm0, %v236_v0  ;;  %v202_v3 = vld [vmem:[#allocation2 + $0x10] sm:$0xff]   ;;  %v203_v4 = vld [vmem:[#allocation2 + $0x18] sm:$0xff]   ;;  %v204_v5 = vld [vmem:[#allocation2 + $0x20] sm:$0xff]  }
  0x14   :  { %176 = vmatpush3.bf16.msra.mxu0 %v200_v1  ;;  %v205_v6 = vld [vmem:[#allocation2 + $0x28] sm:$0xff]   ;;  %v206_v7 = vld [vmem:[#allocation2 + $0x30] sm:$0xff]   ;;  %v207_v8 = vld [vmem:[#allocation2 + $0x38] sm:$0xff]  }
  0x15   :  { %177 = vmatprep.subr.bf16.mxu0 %v236_v0  ;;  %v208_v9 = vld [vmem:[%s282_s0] sm:$0xff]  }
  0x16   :  { %v156_v10 = vld [vmem:[%s284_s2] ss:$0 sm:$0xff] }
  0x18   :  { %178 = vmatpush3.bf16.msra.mxu0 %v201_v2 }
  0x19   :  { %179 = vmatprep.subr.bf16.mxu0 %v236_v0 }
  0x1c   :  { %180 = vmatpush3.bf16.msra.mxu0 %v202_v3 }
  0x1d   :  { %181 = vmatprep.subr.bf16.mxu0 %v236_v0 }
  0x20   :  { %182 = vmatpush3.bf16.msra.mxu0 %v203_v4 }
  0x21   :  { %183 = vmatprep.subr.bf16.mxu0 %v236_v0 }
  0x24   :  { %184 = vmatpush3.bf16.msra.mxu0 %v204_v5 }
  0x25   :  { %185 = vmatprep.subr.bf16.mxu0 %v236_v0 }
  0x28   :  { %186 = vmatpush3.bf16.msra.mxu0 %v205_v6 }
  0x29   :  { %187 = vmatprep.subr.bf16.mxu0 %v236_v0 }
  0x2c   :  { %188 = vmatpush3.bf16.msra.mxu0 %v206_v7 }
  0x2d   :  { %189 = vmatprep.subr.bf16.mxu0 %v236_v0 }
  0x30   :  { %190 = vmatpush3.bf16.msra.mxu0 %v207_v8 }
  0x33   :  { %192 = vmatmul.mubr.bf16.vlgmr.msra.gmra.mrb[0].mxu0 %v208_v9 }
 0x106   :  { %v142_v11 = vpop.f32.mrb[0].mxu0 }
 0x107   :  { %v143_v12 = vadd.f32 %v156_v10, %v142_v11  ;;  %v193_v13 = vpop.f32.mrb[1].mxu0 }
 0x108   :  { %v145_v14 = vpop.f32.mrb[2].mxu0 }
 0x109   :  { %149 = vst [vmem:[%s285_s3] sm:$0xff] %v143_v12  ;;  %v146_v15 = vadd.f32 %v156_v10, %v145_v14  ;;  %v194_v16 = vpop.f32.mrb[3].mxu0 }
 0x10b   :  { %150 = vst [vmem:[%s285_s3 + $0x8] sm:$0xff] %v146_v15 }
 0x10c   :  { %155 = vsyncpa [#allocation3], 1 }

</bundles_post_ra>
